<compile_context>
chip_gen: v6e
topology: v6e:2x2x1
jax: 0.10.0
libtpu: 0.0.40
codegen_flags: <defaults>
</compile_context>

<pallas_src>
import functools

import jax
import jax.numpy as jnp
from jax.experimental import pallas as pl
from jax.experimental.pallas import tpu as pltpu


def _focal_loss_kernel(logits_ref, targets_ref, out_ref, *,
                       gamma, ignore_index, n_total, block_n):
    i = pl.program_id(0)

    x = logits_ref[...].astype(jnp.float32)          # (TN, C)
    t = targets_ref[...]                             # (TN, 1) int32

    # log-sum-exp along class (lane) axis; do NOT materialize log_probs.
    m = jnp.max(x, axis=-1, keepdims=True)
    lse = jnp.log(jnp.sum(jnp.exp(x - m), axis=-1, keepdims=True)) + m

    # NLL gather via one-hot lane mask (F.nll_loss, weight=None, reduction='none')
    cls_ids = jax.lax.broadcasted_iota(jnp.int32, x.shape, 1)
    picked = jnp.sum(jnp.where(cls_ids == t, x, 0.0),
                     axis=-1, keepdims=True) - lse    # (TN, 1)

    valid = t != ignore_index
    if n_total % block_n != 0:
        # Last block reads past the end of the arrays; mask padded rows.
        row_ids = i * block_n + jax.lax.broadcasted_iota(jnp.int32, t.shape, 0)
        valid = jnp.logical_and(valid, row_ids < n_total)

    ce = jnp.where(valid, -picked, 0.0)               # ignored/padded rows -> 0

    # focal weighting: (1 - exp(-ce))^gamma * ce
    w = 1.0 - jnp.exp(-ce)
    if gamma == 2.0:
        # default gamma: two VALU multiplies instead of EUP pow (exp/log chain);
        # no w > 0 guard needed since 0*0*0 == 0.
        focal = w * w * ce
    else:
        focal = jnp.where(w > 0.0, (w ** gamma) * ce, 0.0)

    # Lane-dense per-block partial sum (independent across grid steps).
    out_ref[...] = jnp.broadcast_to(jnp.sum(focal), (1, 128))


def _pick_block_n(n_rows, n_classes, logits_itemsize,
                  vmem_budget_bytes=8 * 1024 * 1024):
    """Pick a row-block size from an explicit VMEM budget.

    Logits rows are lane-padded to a multiple of 128 in VMEM; each input is
    double-buffered by the Pallas pipeline.  Budget is conservative so the same
    choice fits v5e/v6e (128 MiB VMEM) and v7x (64 MiB VMEM).
    """
    padded_lanes = ((n_classes + 127) // 128) * 128
    bytes_per_row = (padded_lanes * logits_itemsize + 128 * 4) * 2  # x2 double buffer
    bn = max(8, vmem_budget_bytes // bytes_per_row)
    bn = min(bn, 2048)                                # diminishing returns beyond this
    bn = min(bn, ((n_rows + 7) // 8) * 8)             # don't exceed (padded) N
    bn = max(8, (bn // 8) * 8)                        # sublane multiple of 8
    return int(bn)


def focal_loss(logits, targets, *, gamma=2.0, ignore_index=-100, block_n=None):
    """FocalLoss(gamma, alpha=None, reduction='mean', ignore_index) forward."""
    # TODO(synk): alpha (per-class nll weight) is None in the default module;
    #             per-class weighting is not implemented here.
    N, C = logits.shape
    if block_n is None:
        block_n = _pick_block_n(N, C, jnp.dtype(logits.dtype).itemsize)
    n_blocks = int(pl.cdiv(N, block_n))
    targets_2d = targets.astype(jnp.int32).reshape(N, 1)

    kernel = functools.partial(
        _focal_loss_kernel, gamma=float(gamma), ignore_index=int(ignore_index),
        n_total=int(N), block_n=int(block_n))

    partials = pl.pallas_call(
        kernel,
        out_shape=jax.ShapeDtypeStruct((1, 128 * n_blocks), jnp.float32),
        grid_spec=pltpu.PrefetchScalarGridSpec(
            num_scalar_prefetch=0,
            grid=(n_blocks,),
            in_specs=[
                pl.BlockSpec((block_n, C), lambda i: (i, 0)),
                pl.BlockSpec((block_n, 1), lambda i: (i, 0)),
            ],
            out_specs=pl.BlockSpec((1, 128), lambda i: (0, i)),
        ),
        compiler_params=pltpu.CompilerParams(
            dimension_semantics=("parallel",),
            vmem_limit_bytes=32 * 1024 * 1024),
    )(logits, targets_2d)

    # Each block wrote its partial sum broadcast across its (1, 128) lane slab;
    # take lane 0 of each block and reduce.  reduction='mean' divides by the
    # TOTAL number of samples (including ignored ones) — matches the PyTorch
    # module's focal_loss.mean(); do not "fix" to valid-count normalization.
    per_block = partials.reshape(n_blocks, 128)[:, 0]
    return jnp.sum(per_block) / jnp.float32(N)


def _focal_loss_ref(logits, targets, *, gamma=2.0, ignore_index=-100):
    """Pure-JAX reference mirroring the PyTorch module."""
    log_probs = jax.nn.log_softmax(logits.astype(jnp.float32), axis=1)
    picked = jnp.take_along_axis(
        log_probs, jnp.clip(targets, 0, logits.shape[1] - 1)[:, None], axis=1)[:, 0]
    valid = targets != ignore_index
    ce = jnp.where(valid, -picked, 0.0)
    probs = jnp.exp(-ce)
    focal = (1.0 - probs) ** gamma * ce
    return focal.mean()


if __name__ == "__main__":
    key = jax.random.PRNGKey(0)
    k_logits, k_targets = jax.random.split(key)

    # Case 1: N divisible by the chosen block (16 samples, 24 classes).
    N, C = 16, 24
    logits = jax.random.normal(k_logits, (N, C), dtype=jnp.float32)
    targets = jax.random.randint(k_targets, (N,), 0, C, dtype=jnp.int32)
    targets = targets.at[3].set(-100)       # exercise ignore_index masking

    loss = focal_loss(logits, targets)
    jax.block_until_ready(loss)
    ref = _focal_loss_ref(logits, targets)
    assert jnp.allclose(loss, ref, atol=1e-5, rtol=1e-5), (loss, ref)

    # Case 2: ragged N (not a multiple of 8) exercises the in-kernel row mask.
    N2 = 13
    logits2 = logits[:N2]
    targets2 = targets[:N2]
    loss2 = focal_loss(logits2, targets2)
    jax.block_until_ready(loss2)
    ref2 = _focal_loss_ref(logits2, targets2)
    assert jnp.allclose(loss2, ref2, atol=1e-5, rtol=1e-5), (loss2, ref2)

    print("KERNEL_OK")
</pallas_src>

<mosaic_0001>
module attributes {stable_mosaic.version = 11 : i64} {
  func.func @_focal_loss_kernel(%arg0: i32, %arg1: memref<16x24xf32, #tpu.memory_space<vmem>>, %arg2: memref<16x1xi32, #tpu.memory_space<vmem>>, %arg3: memref<1x128xf32, #tpu.memory_space<vmem>>) attributes {dimension_semantics = [#tpu.dimension_semantics<parallel>], iteration_bounds = array<i64: 1>, scalar_prefetch = 0 : i64, scratch_operands = 0 : i64, tpu.core_type = #tpu.core_type<tc>, window_params = [{transform_indices = @transform_0, window_bounds = array<i64: 16, 24>}, {transform_indices = @transform_1, window_bounds = array<i64: 16, 1>}, {transform_indices = @transform_2, window_bounds = array<i64: 1, 128>}]} {
    %c0 = arith.constant 0 : index
    %c0_0 = arith.constant 0 : index
    %0 = vector.load %arg1[%c0, %c0_0] : memref<16x24xf32, #tpu.memory_space<vmem>>, vector<16x24xf32>
    %c0_1 = arith.constant 0 : index
    %c0_2 = arith.constant 0 : index
    %1 = vector.load %arg2[%c0_1, %c0_2] : memref<16x1xi32, #tpu.memory_space<vmem>>, vector<16x1xi32>
    %cst = arith.constant dense<0xFF800000> : vector<16xf32>
    %2 = vector.multi_reduction <maximumf>, %0, %cst [1] : vector<16x24xf32> to vector<16xf32>
    %3 = vector.shape_cast %2 : vector<16xf32> to vector<16x1xf32>
    %4 = vector.broadcast %3 : vector<16x1xf32> to vector<16x24xf32>
    %5 = arith.subf %0, %4 : vector<16x24xf32>
    %6 = math.exp %5 : vector<16x24xf32>
    %cst_3 = arith.constant dense<0.000000e+00> : vector<16xf32>
    %7 = vector.multi_reduction <add>, %6, %cst_3 [1] : vector<16x24xf32> to vector<16xf32>
    %8 = vector.shape_cast %7 : vector<16xf32> to vector<16x1xf32>
    %9 = math.log %8 : vector<16x1xf32>
    %10 = arith.addf %9, %3 : vector<16x1xf32>
    %11 = tpu.iota {dimensions = array<i32: 1>} : vector<16x24xi32>
    %12 = vector.broadcast %1 : vector<16x1xi32> to vector<16x24xi32>
    %13 = arith.cmpi eq, %11, %12 : vector<16x24xi32>
    %cst_4 = arith.constant 0.000000e+00 : f32
    %14 = vector.broadcast %cst_4 : f32 to vector<16x24xf32>
    %15 = arith.select %13, %0, %14 : vector<16x24xi1>, vector<16x24xf32>
    %cst_5 = arith.constant dense<0.000000e+00> : vector<16xf32>
    %16 = vector.multi_reduction <add>, %15, %cst_5 [1] : vector<16x24xf32> to vector<16xf32>
    %17 = vector.shape_cast %16 : vector<16xf32> to vector<16x1xf32>
    %18 = arith.subf %17, %10 : vector<16x1xf32>
    %c-100_i32 = arith.constant -100 : i32
    %19 = vector.broadcast %c-100_i32 : i32 to vector<16x1xi32>
    %20 = arith.cmpi ne, %1, %19 : vector<16x1xi32>
    %cst_6 = arith.constant 0.000000e+00 : f32
    %21 = vector.broadcast %cst_6 : f32 to vector<16x1xf32>
    %22 = arith.subf %21, %18 : vector<16x1xf32>
    %cst_7 = arith.constant 0.000000e+00 : f32
    %23 = vector.broadcast %cst_7 : f32 to vector<16x1xf32>
    %24 = arith.select %20, %22, %23 : vector<16x1xi1>, vector<16x1xf32>
    %cst_8 = arith.constant 0.000000e+00 : f32
    %25 = vector.broadcast %cst_8 : f32 to vector<16x1xf32>
    %26 = arith.subf %25, %24 : vector<16x1xf32>
    %27 = math.exp %26 : vector<16x1xf32>
    %cst_9 = arith.constant 1.000000e+00 : f32
    %28 = vector.broadcast %cst_9 : f32 to vector<16x1xf32>
    %29 = arith.subf %28, %27 : vector<16x1xf32>
    %30 = arith.mulf %29, %29 : vector<16x1xf32>
    %31 = arith.mulf %30, %24 : vector<16x1xf32>
    %32 = vector.shape_cast %31 : vector<16x1xf32> to vector<1x16x1xf32>
    %cst_10 = arith.constant dense<0.000000e+00> : vector<1xf32>
    %33 = vector.multi_reduction <add>, %32, %cst_10 [1, 2] : vector<1x16x1xf32> to vector<1xf32>
    %34 = vector.shape_cast %33 : vector<1xf32> to vector<1x1x1xf32>
    %35 = vector.extract %34[0, 0, 0] : f32 from vector<1x1x1xf32>
    %36 = vector.broadcast %35 : f32 to vector<1x128xf32>
    %c0_11 = arith.constant 0 : index
    %c0_12 = arith.constant 0 : index
    %37 = vector.load %arg3[%c0_11, %c0_12] : memref<1x128xf32, #tpu.memory_space<vmem>>, vector<1x128xf32>
    tpu.vector_store %arg3[%c0_11, %c0_12], %36 {strides = array<i32>} : memref<1x128xf32, #tpu.memory_space<vmem>>, vector<1x128xf32>,
    return
  }
  func.func @transform_0(%arg0: i32) -> (i32, i32) {
    %c0_i32 = arith.constant 0 : i32
    %c0_i32_0 = arith.constant 0 : i32
    return %arg0, %c0_i32 : i32, i32
  }
  func.func @transform_1(%arg0: i32) -> (i32, i32) {
    %c0_i32 = arith.constant 0 : i32
    %c0_i32_0 = arith.constant 0 : i32
    return %arg0, %c0_i32 : i32, i32
  }
  func.func @transform_2(%arg0: i32) -> (i32, i32) {
    %c0_i32 = arith.constant 0 : i32
    %c0_i32_0 = arith.constant 0 : i32
    return %c0_i32, %arg0 : i32, i32
  }
}

</mosaic_0001>

<bundles_post_ra>
// kernel: tpu_custom_call.1
= control target key start
LH: loop header
LB: loop body
LE: loop exit
PB: predicated region body
PF: predicated region fallthrough
CT: control target
= control target key end

     0   :  { %vm16_vm0 = vcmask 195584   ;;  %v148_v4 = vmov 0   ;;  %s186_s0 = inlined_call_operand.vmem [shape: f32[16,24], index: 0, kind: input, shape index: {}]   ;;  %s187_s1 = inlined_call_operand.vmem [shape: s32[16,1], index: 1, kind: input, shape index: {}]   ;;  %s188_s2 = inlined_call_operand.hbm [shape: f32[1,128], index: 2, kind: output, shape index: {}]  }
   0x1   :  { %v12_v0 = vld [vmem:[%s186_s0] sm:$0xff]  ;;  %v13_v1 = vld [vmem:[%s186_s0 + $0x8] sm:$0xff]  ;;  %112 = vset.pattern.permute.xlu1 %v148_v4  ;;  %113 = vset.pattern.permute.xlu0 %v148_v4 }
   0x2   :  { %v14_v2 = vld [vmem:[%s187_s1] sm:$0xff]  ;;  %v17_v3 = vsel %vm16_vm0, %v12_v0, -inf }
   0x3   :  { %7 = vsyncpa [#allocation3], 0  ;;  %18 = vmax.xlane.f32.xlu0 %v17_v3  ;;  %44 = vperm.xlu1 %112, %v14_v2   ;;  %v20_v5 = vsel %vm16_vm0, %v13_v1, -inf  ;;  %v15_v6 = vld [vmem:[%s187_s1 + $0x8] sm:$0xff]  ;;  %v41_v13 = vlaneseq  ;;  %vm61_vm3 = vcmp.ne.s32.totalorder %v14_v2, 4294967196  ;;  %vm79_vm5 = vcmask 7168  }
   0x4   :  { %vm62_vm4 = vcmp.ne.s32.totalorder %v15_v6, 4294967196  ;;  %s149_s0 = smov [#allocation2]  }
   0x5   :  { %v42_v15 = vand.u32 127, %v41_v13  ;;  %s100_s1 = sshll.u32 %s149_s0, 4  ;;  %s101_s1 = int_to_ptr.vmem [resolvable:$true] %s100_s1 }
   0x6   :  { %s126_s18 = scalar_lea.vmem %s101_s1, 16  ;;  %s130_s19 = scalar_lea.vmem %s101_s1, 32 }
   0x7   :  { %21 = vmax.xlane.f32.xlu0 %v20_v5  ;;  %47 = vperm.xlu1 %112, %v15_v6   ;;  %p127_p0 = scmp.ne.s32.totalorder %s101_s1, %s126_s18  ;;  %p131_p1 = scmp.lt.s32.totalorder %s101_s1, %s101_s1 }
   0x8   :  { %p132_p2 = scmp.lt.s32.totalorder %s130_s19, %s126_s18 }
   0xa   :  { %p133_p3 = por %p132_p2, %p131_p1 }
   0xc   :  { %p134_p4 = pnand %p133_p3, %p127_p0 }
  0x7e   :  { %v45_v14 = vpop.permute.xlu1 %44 }
  0x7f   :  { %vm49_vm1 = vcmp.eq.s32.totalorder %v42_v15, %v45_v14 }
  0x80   :  { %v51_v18 = vsel %vm49_vm1, %v12_v0, 0.0 }
  0x81   :  { %v53_v20 = vsel %vm16_vm0, %v51_v18, 0.0 }
  0x82   :  { %v48_v16 = vpop.permute.xlu1 %47 }
  0x83   :  { %vm50_vm2 = vcmp.eq.s32.totalorder %v42_v15, %v48_v16 }
  0x84   :  { %v52_v22 = vsel %vm50_vm2, %v13_v1, 0.0 }
  0x85   :  { %v56_v24 = vsel %vm16_vm0, %v52_v22, 0.0 }
  0x8c   :  { %v19_v7 = vpop.xlane.xlu0 %18 }
  0x8d   :  { %v23_v8 = vsub.f32 %v12_v0, %v19_v7 }
  0x8f   :  { %v25_v9 = vmul.f32 1.442695, %v23_v8 }
  0x90   :  { %v22_v10 = vpop.xlane.xlu0 %21 }
  0x91   :  { %114 = vpow2.f32 %v25_v9  ;;  %v24_v11 = vsub.f32 %v13_v1, %v22_v10 }
  0x93   :  { %v27_v12 = vmul.f32 1.442695, %v24_v11 }
  0x95   :  { %116 = vpow2.f32 %v27_v12 }
  0x9e   :  { %v115_v17 = vpop.eup %114 }
  0x9f   :  { %v29_v19 = vsel %vm16_vm0, %v115_v17, 0.0 }
  0xa0   :  { %30 = vadd.xlane.f32.xlu0 %v29_v19 }
  0xa2   :  { %v117_v21 = vpop.eup %116 }
  0xa3   :  { %v32_v23 = vsel %vm16_vm0, %v117_v21, 0.0 }
  0xa4   :  { %33 = vadd.xlane.f32.xlu1 %v32_v23  ;;  %54 = vadd.xlane.f32.xlu0 %v53_v20 }
  0xa8   :  { %57 = vadd.xlane.f32.xlu0 %v56_v24 }
 0x129   :  { %v31_v25 = vpop.xlane.xlu0 %30 }
 0x12a   :  { %118 = vlog2.f32 %v31_v25 }
 0x12d   :  { %v34_v26 = vpop.xlane.xlu1 %33  ;;  %v55_v29 = vpop.xlane.xlu0 %54 }
 0x12e   :  { %120 = vlog2.f32 %v34_v26 }
 0x131   :  { %v58_v36 = vpop.xlane.xlu0 %57 }
 0x137   :  { %v119_v27 = vpop.eup %118 }
 0x138   :  { %v36_v28 = vmul.f32 0.6931472, %v119_v27 }
 0x13a   :  { %v39_v30 = vadd.f32 %v36_v28, %v19_v7 }
 0x13b   :  { %v121_v31 = vpop.eup %120 }
 0x13c   :  { %v38_v32 = vmul.f32 0.6931472, %v121_v31  ;;  %v59_v33 = vsub.f32 %v55_v29, %v39_v30 }
 0x13e   :  { %v63_v34 = vsub.f32 0.0, %v59_v33  ;;  %v40_v35 = vadd.f32 %v38_v32, %v22_v10 }
 0x140   :  { %v65_v37 = vsel %vm61_vm3, %v63_v34, 0.0  ;;  %v60_v38 = vsub.f32 %v58_v36, %v40_v35 }
 0x141   :  { %v67_v39 = vsub.f32 0.0, %v65_v37 }
 0x142   :  { %v64_v40 = vsub.f32 0.0, %v60_v38 }
 0x143   :  { %v69_v41 = vmul.f32 1.442695, %v67_v39 }
 0x144   :  { %v66_v42 = vsel %vm62_vm4, %v64_v40, 0.0 }
 0x145   :  { %122 = vpow2.f32 %v69_v41  ;;  %v68_v43 = vsub.f32 0.0, %v66_v42 }
 0x147   :  { %v71_v44 = vmul.f32 1.442695, %v68_v43 }
 0x149   :  { %124 = vpow2.f32 %v71_v44 }
 0x152   :  { %v123_v45 = vpop.eup %122 }
 0x153   :  { %v73_v46 = vsub.f32 1.0, %v123_v45 }
 0x155   :  { %v75_v47 = vmul.f32 %v73_v46, %v73_v46 }
 0x156   :  { %v125_v48 = vpop.eup %124 }
 0x157   :  { %v74_v49 = vsub.f32 1.0, %v125_v48  ;;  %v77_v50 = vmul.f32 %v75_v47, %v65_v37 }
 0x159   :  { %v76_v51 = vmul.f32 %v74_v49, %v74_v49  ;;  %v80_v53 = vsel %vm79_vm5, %v77_v50, 0.0 }
 0x15b   :  { %v78_v52 = vmul.f32 %v76_v51, %v66_v42 }
 0x15d   :  { %v81_v54 = vsel %vm79_vm5, %v78_v52, 0.0 }
 0x15e   :  { %v82_v55 = vadd.f32 %v81_v54, %v80_v53 }
 0x160   :  { %83 = vadd.xlane.f32.xlu0 %v82_v55 }
 0x1e9   :  { %v84_v56 = vpop.xlane.xlu0 %83 }
 0x1ea   :  { %v85_v57 = vrot.slane %v84_v56, 4 }
 0x1ec   :  { %v86_v58 = vadd.f32 %v85_v57, %v84_v56 }
 0x1ee   :  { %v87_v59 = vrot.slane %v86_v58, 2 }
 0x1f0   :  { %v88_v60 = vadd.f32 %v87_v59, %v86_v58 }
 0x1f2   :  { %v89_v61 = vrot.slane %v88_v60, 1 }
 0x1f4   :  { %v90_v62 = vadd.f32 %v89_v61, %v88_v60 }
 0x1f6   :  { %108 = vpush %v90_v62 }
 0x227   :  { %s109_s17 = spop %108 }
 0x228   :  { %v92_v63 = vstv %s109_s17 }
 0x229   :  { %93 = vst [vmem:[#allocation2] sm:$0x1] %v92_v63 }
 0x22a   :  { %137 = shalt.err (!%p134_p4)
}
 0x22b   :  { %103 = dma.vmem_to_hbm [thread:$0]  %s101_s1, 16, %s188_s2, [#allocation3]  }
 0x22c   :  { %146 = dma.done.wait [#allocation3], 16  }
 0x22d   :  { %147 = vsyncadd [#allocation3], 4294967280 }
 0x22e   :  { %107 = vsyncpa [#allocation3], 1 }

</bundles_post_ra>
